<compile_context>
chip_gen: v6e
topology: v6e:2x2x1
jax: 0.10.0
libtpu: 0.0.40
codegen_flags: <defaults>
</compile_context>

<pallas_src>
import jax
import jax.numpy as jnp
from jax.experimental import pallas as pl
from jax.experimental.pallas import tpu as pltpu


def _round_up(x, m):
    return ((x + m - 1) // m) * m


def _mlp_head_kernel(x_ref, w1_ref, b1_ref, w2_ref, b2_ref, w3_ref, b3_ref,
                     o_ref):
    """Fused head: (TB,E) -> (TB,E) -> (TB,Hp) -> (1,TB) lane-dense output."""
    # bf16 cast fused into the kernel (input DMA'd as f32 rows).
    x = x_ref[...].astype(jnp.bfloat16)                           # (TB, E)

    h1 = jnp.dot(x, w1_ref[...], preferred_element_type=jnp.float32)
    h1 = jnp.maximum(h1 + b1_ref[...], 0.0)                       # (TB, E) f32

    h2 = jnp.dot(h1.astype(jnp.bfloat16), w2_ref[...],
                 preferred_element_type=jnp.float32)
    h2 = jnp.maximum(h2 + b2_ref[...], 0.0)                       # (TB, Hp) f32

    # Final Linear(Hp, 1): VPU multiply + lane reduce (MXU stays free).
    y = jnp.sum(h2 * w3_ref[...], axis=-1, keepdims=True)         # (TB, 1) f32
    y = y + b3_ref[0, 0]                                          # SMEM scalar

    # Batch along lanes -> unmasked lane-dense store.
    o_ref[...] = jnp.transpose(y).astype(o_ref.dtype)             # (1, TB)


def esm_regression_head(cls_emb, params):
    """cls_emb: (B, E) float. params: dict of weights/biases. Returns (B, 1) f32."""
    B, E = cls_emb.shape
    H = params["w2"].shape[1]
    Hp = _round_up(H, 128)          # zero-pad hidden dim (exact no-op numerically)
    pad_h = Hp - H

    # Batch tile: multiple of 128 (lane-dense output) unless B is tiny; sized
    # so the "parallel" grid has >= 2 steps when B > 128 (v7x megacore).
    if B <= 128:
        TB = B
    else:
        TB = min(512, max(128, _round_up(pl.cdiv(B, 2), 128)))
    grid = (pl.cdiv(B, TB),)

    # bf16 on the matmul path, f32 everywhere precision matters.
    x = cls_emb.astype(jnp.float32)
    w1 = params["w1"].astype(jnp.bfloat16)
    b1 = params["b1"].astype(jnp.float32).reshape(1, E)
    w2 = jnp.pad(params["w2"].astype(jnp.bfloat16), ((0, 0), (0, pad_h)))
    b2 = jnp.pad(params["b2"].astype(jnp.float32).reshape(1, H),
                 ((0, 0), (0, pad_h)))
    w3 = jnp.pad(params["w3"].astype(jnp.float32).reshape(1, H),
                 ((0, 0), (0, pad_h)))
    b3 = params["b3"].astype(jnp.float32).reshape(1, 1)           # -> SMEM

    flops = 2 * B * (E * E + E * Hp + Hp)
    bytes_accessed = (x.size * 4 + w1.size * 2 + w2.size * 2
                      + (b1.size + b2.size + w3.size + b3.size) * 4
                      + B * 4)

    out_row = pl.pallas_call(
        _mlp_head_kernel,
        out_shape=jax.ShapeDtypeStruct((1, B), jnp.float32),
        grid=grid,
        in_specs=[
            pl.BlockSpec((TB, E), lambda i: (i, 0)),              # x: batch-tiled
            pl.BlockSpec((E, E), lambda i: (0, 0)),               # w1: resident
            pl.BlockSpec((1, E), lambda i: (0, 0)),               # b1
            pl.BlockSpec((E, Hp), lambda i: (0, 0)),              # w2: resident
            pl.BlockSpec((1, Hp), lambda i: (0, 0)),              # b2
            pl.BlockSpec((1, Hp), lambda i: (0, 0)),              # w3 row
            pl.BlockSpec(memory_space=pltpu.MemorySpace.SMEM),    # b3 scalar
        ],
        out_specs=pl.BlockSpec((1, TB), lambda i: (0, i)),
        compiler_params=pltpu.CompilerParams(
            dimension_semantics=("parallel",)),
        cost_estimate=pl.CostEstimate(
            flops=int(flops), transcendentals=0,
            bytes_accessed=int(bytes_accessed)),
    )(x, w1, b1, w2, b2, w3, b3)

    return out_row.reshape(B, 1)


def esm_regression_forward(last_hidden_state, params):
    """Mirrors ESMRegressionModel.forward given the backbone output.

    last_hidden_state: (B, S, E) -- stand-in for esm_model(**batch_x).last_hidden_state
    """
    cls_emb = last_hidden_state[:, 0, :]          # (B, E)  -- [:, 0, :] in PyTorch
    return esm_regression_head(cls_emb, params)


def init_params(key, E):
    """Deterministic init matching nn.Linear default (uniform +/- 1/sqrt(fan_in))."""
    H = E // 2
    ks = jax.random.split(key, 6)

    def u(k, shape, fan_in):
        bound = 1.0 / jnp.sqrt(jnp.float32(fan_in))
        return jax.random.uniform(k, shape, jnp.float32, -bound, bound)

    return {
        "w1": u(ks[0], (E, E), E), "b1": u(ks[1], (1, E), E),
        "w2": u(ks[2], (E, H), E), "b2": u(ks[3], (1, H), E),
        "w3": u(ks[4], (1, H), H),   # row layout (same as PyTorch (1, H) weight)
        "b3": u(ks[5], (1, 1), H),
    }


def _reference(last_hidden_state, params):
    """Pure-JAX reference with the same bf16/f32 mixed precision as the kernel."""
    x = last_hidden_state[:, 0, :].astype(jnp.bfloat16)
    w1 = params["w1"].astype(jnp.bfloat16)
    w2 = params["w2"].astype(jnp.bfloat16)
    h1 = jnp.maximum(
        jnp.dot(x, w1, preferred_element_type=jnp.float32) + params["b1"], 0.0)
    h2 = jnp.maximum(
        jnp.dot(h1.astype(jnp.bfloat16), w2,
                preferred_element_type=jnp.float32) + params["b2"], 0.0)
    return jnp.sum(h2 * params["w3"], axis=-1, keepdims=True) + params["b3"]


if __name__ == "__main__":
    # Small shapes: batch=2, seq=8, hidden=32 (real ESM2-t30-150M has E=640).
    B, S, E = 2, 8, 32

    key = jax.random.PRNGKey(0)
    k_hidden, k_params = jax.random.split(key)

    # Synthetic stand-in for the frozen ESM backbone's last_hidden_state.
    last_hidden_state = jax.random.normal(k_hidden, (B, S, E), jnp.float32)
    params = init_params(k_params, E)

    out = esm_regression_forward(last_hidden_state, params)
    out = jax.block_until_ready(out)

    ref = _reference(last_hidden_state, params)
    assert out.shape == (B, 1), out.shape
    assert jnp.allclose(out, ref, atol=2e-3, rtol=2e-3), (out, ref)

    print("KERNEL_OK")
</pallas_src>

<mosaic_0001>
module attributes {stable_mosaic.version = 11 : i64} {
  func.func @_mlp_head_kernel(%arg0: i32, %arg1: memref<2x32xf32, #tpu.memory_space<vmem>>, %arg2: memref<32x32xbf16, #tpu.memory_space<vmem>>, %arg3: memref<1x32xf32, #tpu.memory_space<vmem>>, %arg4: memref<32x128xbf16, #tpu.memory_space<vmem>>, %arg5: memref<1x128xf32, #tpu.memory_space<vmem>>, %arg6: memref<1x128xf32, #tpu.memory_space<vmem>>, %arg7: memref<1x1xf32, #tpu.memory_space<smem>>, %arg8: memref<1x2xf32, #tpu.memory_space<vmem>>) attributes {dimension_semantics = [#tpu.dimension_semantics<parallel>], iteration_bounds = array<i64: 1>, scalar_prefetch = 0 : i64, scratch_operands = 0 : i64, tpu.core_type = #tpu.core_type<tc>, window_params = [{transform_indices = @transform_0, window_bounds = array<i64: 2, 32>}, {pipeline_mode = #tpu.pipeline_mode<synchronous>, transform_indices = @transform_1, window_bounds = array<i64: 32, 32>}, {pipeline_mode = #tpu.pipeline_mode<synchronous>, transform_indices = @transform_2, window_bounds = array<i64: 1, 32>}, {pipeline_mode = #tpu.pipeline_mode<synchronous>, transform_indices = @transform_3, window_bounds = array<i64: 32, 128>}, {pipeline_mode = #tpu.pipeline_mode<synchronous>, transform_indices = @transform_4, window_bounds = array<i64: 1, 128>}, {pipeline_mode = #tpu.pipeline_mode<synchronous>, transform_indices = @transform_5, window_bounds = array<i64: 1, 128>}, {transform_indices = @transform_6, window_bounds = array<i64: 1, 1>}, {transform_indices = @transform_7, window_bounds = array<i64: 1, 2>}]} {
    %c0 = arith.constant 0 : index
    %c0_0 = arith.constant 0 : index
    %0 = vector.load %arg1[%c0, %c0_0] : memref<2x32xf32, #tpu.memory_space<vmem>>, vector<2x32xf32>
    %1 = arith.truncf %0 : vector<2x32xf32> to vector<2x32xbf16>
    %c0_1 = arith.constant 0 : index
    %c0_2 = arith.constant 0 : index
    %2 = vector.load %arg2[%c0_1, %c0_2] : memref<32x32xbf16, #tpu.memory_space<vmem>>, vector<32x32xbf16>
    %cst = arith.constant dense<0.000000e+00> : vector<2x32xf32>
    %3 = tpu.matmul %1, %2, %cst {dimension_numbers = #tpu.dot_dimension_numbers<[1], [0], [0], [1], [0, 0, 1, 1], [], []>} : vector<2x32xbf16>, vector<32x32xbf16>, vector<2x32xf32> -> vector<2x32xf32>
    %c0_3 = arith.constant 0 : index
    %c0_4 = arith.constant 0 : index
    %4 = vector.load %arg3[%c0_3, %c0_4] : memref<1x32xf32, #tpu.memory_space<vmem>>, vector<1x32xf32>
    %5 = vector.broadcast %4 : vector<1x32xf32> to vector<2x32xf32>
    %6 = arith.addf %3, %5 : vector<2x32xf32>
    %cst_5 = arith.constant 0.000000e+00 : f32
    %7 = vector.broadcast %cst_5 : f32 to vector<2x32xf32>
    %8 = arith.maximumf %6, %7 : vector<2x32xf32>
    %9 = arith.truncf %8 : vector<2x32xf32> to vector<2x32xbf16>
    %c0_6 = arith.constant 0 : index
    %c0_7 = arith.constant 0 : index
    %10 = vector.load %arg4[%c0_6, %c0_7] : memref<32x128xbf16, #tpu.memory_space<vmem>>, vector<32x128xbf16>
    %cst_8 = arith.constant dense<0.000000e+00> : vector<2x128xf32>
    %11 = tpu.matmul %9, %10, %cst_8 {dimension_numbers = #tpu.dot_dimension_numbers<[1], [0], [0], [1], [0, 0, 1, 1], [], []>} : vector<2x32xbf16>, vector<32x128xbf16>, vector<2x128xf32> -> vector<2x128xf32>
    %c0_9 = arith.constant 0 : index
    %c0_10 = arith.constant 0 : index
    %12 = vector.load %arg5[%c0_9, %c0_10] : memref<1x128xf32, #tpu.memory_space<vmem>>, vector<1x128xf32>
    %13 = vector.broadcast %12 : vector<1x128xf32> to vector<2x128xf32>
    %14 = arith.addf %11, %13 : vector<2x128xf32>
    %cst_11 = arith.constant 0.000000e+00 : f32
    %15 = vector.broadcast %cst_11 : f32 to vector<2x128xf32>
    %16 = arith.maximumf %14, %15 : vector<2x128xf32>
    %c0_12 = arith.constant 0 : index
    %c0_13 = arith.constant 0 : index
    %17 = vector.load %arg6[%c0_12, %c0_13] : memref<1x128xf32, #tpu.memory_space<vmem>>, vector<1x128xf32>
    %18 = vector.broadcast %17 : vector<1x128xf32> to vector<2x128xf32>
    %19 = arith.mulf %16, %18 : vector<2x128xf32>
    %cst_14 = arith.constant dense<0.000000e+00> : vector<2xf32>
    %20 = vector.multi_reduction <add>, %19, %cst_14 [1] : vector<2x128xf32> to vector<2xf32>
    %21 = vector.shape_cast %20 : vector<2xf32> to vector<2x1xf32>
    %c0_15 = arith.constant 0 : index
    %c0_16 = arith.constant 0 : index
    %22 = memref.load %arg7[%c0_15, %c0_16] : memref<1x1xf32, #tpu.memory_space<smem>>
    %23 = vector.broadcast %22 : f32 to vector<2x1xf32>
    %24 = arith.addf %21, %23 : vector<2x1xf32>
    %25 = tpu.transpose %24, [1, 0] : vector<2x1xf32> -> vector<1x2xf32>
    %c0_17 = arith.constant 0 : index
    %c0_18 = arith.constant 0 : index
    %26 = vector.load %arg8[%c0_17, %c0_18] : memref<1x2xf32, #tpu.memory_space<vmem>>, vector<1x2xf32>
    tpu.vector_store %arg8[%c0_17, %c0_18], %25 {strides = array<i32>} : memref<1x2xf32, #tpu.memory_space<vmem>>, vector<1x2xf32>,
    return
  }
  func.func @transform_0(%arg0: i32) -> (i32, i32) {
    %c0_i32 = arith.constant 0 : i32
    %c0_i32_0 = arith.constant 0 : i32
    return %arg0, %c0_i32 : i32, i32
  }
  func.func @transform_1(%arg0: i32) -> (i32, i32) {
    %c0_i32 = arith.constant 0 : i32
    %c0_i32_0 = arith.constant 0 : i32
    %c0_i32_1 = arith.constant 0 : i32
    return %c0_i32, %c0_i32_0 : i32, i32
  }
  func.func @transform_2(%arg0: i32) -> (i32, i32) {
    %c0_i32 = arith.constant 0 : i32
    %c0_i32_0 = arith.constant 0 : i32
    %c0_i32_1 = arith.constant 0 : i32
    return %c0_i32, %c0_i32_0 : i32, i32
  }
  func.func @transform_3(%arg0: i32) -> (i32, i32) {
    %c0_i32 = arith.constant 0 : i32
    %c0_i32_0 = arith.constant 0 : i32
    %c0_i32_1 = arith.constant 0 : i32
    return %c0_i32, %c0_i32_0 : i32, i32
  }
  func.func @transform_4(%arg0: i32) -> (i32, i32) {
    %c0_i32 = arith.constant 0 : i32
    %c0_i32_0 = arith.constant 0 : i32
    %c0_i32_1 = arith.constant 0 : i32
    return %c0_i32, %c0_i32_0 : i32, i32
  }
  func.func @transform_5(%arg0: i32) -> (i32, i32) {
    %c0_i32 = arith.constant 0 : i32
    %c0_i32_0 = arith.constant 0 : i32
    %c0_i32_1 = arith.constant 0 : i32
    return %c0_i32, %c0_i32_0 : i32, i32
  }
  func.func @transform_6(%arg0: i32) -> (i32, i32) {
    %c0_i32 = arith.constant 0 : i32
    %c0_i32_0 = arith.constant 0 : i32
    %c0_i32_1 = arith.constant 0 : i32
    return %c0_i32, %c0_i32_0 : i32, i32
  }
  func.func @transform_7(%arg0: i32) -> (i32, i32) {
    %c0_i32 = arith.constant 0 : i32
    %c0_i32_0 = arith.constant 0 : i32
    return %c0_i32, %arg0 : i32, i32
  }
}

</mosaic_0001>

<bundles_post_ra>
// kernel: tpu_custom_call.1
= control target key start
LH: loop header
LB: loop body
LE: loop exit
PB: predicated region body
PF: predicated region fallthrough
CT: control target
= control target key end

     0   :  { %13 = vsyncpa [#allocation4], 0  ;;  %s439_s0 = inlined_call_operand.vmem [shape: f32[2,32], index: 0, kind: input, shape index: {}]   ;;  %s440_s1 = inlined_call_operand.hbm [shape: bf16[32,32], index: 1, kind: input, shape index: {}]   ;;  %s441_s2 = inlined_call_operand.vmem [shape: f32[1,32], index: 2, kind: input, shape index: {}]   ;;  %s442_s3 = inlined_call_operand.hbm [shape: bf16[32,128], index: 3, kind: input, shape index: {}]   ;;  %s443_s4 = inlined_call_operand.vmem [shape: f32[1,128], index: 4, kind: input, shape index: {}]   ;;  %s444_s5 = inlined_call_operand.vmem [shape: f32[1,128], index: 5, kind: input, shape index: {}]   ;;  %s445_s6 = inlined_call_operand.<no memory space> [shape: f32[1,1], index: 6, kind: input, shape index: {}]   ;;  %s446_s7 = inlined_call_operand.hbm [shape: f32[1,2], index: 7, kind: output, shape index: {}]  }
   0x1   :  { %14 = vsyncpa [#allocation7], 0 }
   0x2   :  { %15 = vsyncpa [#allocation5], 0  ;;  %s368_s24 = smov [#allocation3]  }
   0x3   :  { %s23_s25 = sshll.u32 %s368_s24, 4  ;;  %s24_s25 = int_to_ptr.vmem [resolvable:$true] %s23_s25 }
   0x4   :  { %s310_s26 = scalar_lea.vmem %s24_s25, 256  ;;  %p315_p1 = scmp.lt.s32.totalorder %s24_s25, %s24_s25 }
   0x5   :  { %p311_p0 = scmp.ne.s32.totalorder %s24_s25, %s310_s26  ;;  %p316_p2 = scmp.lt.s32.totalorder %s310_s26, %s310_s26 }
   0x7   :  { %p317_p3 = por %p316_p2, %p315_p1 }
   0x9   :  { %p318_p4 = pnand %p317_p3, %p311_p0 }
   0xb   :  { %321 = shalt.err (!%p318_p4)
}
   0xc   :  { %s369_s27 = smov 64   ;;  %s370_s28 = smov 4  }
   0xd   :  { %29 = dma.hbm_to_vmem [thread:$0]  %s440_s1, 256, %s24_s25, [#allocation4], %s369_s27, %s369_s27, %s370_s28  }
   0xe   :  { %s371_s8 = smov [#allocation6]  }
   0xf   :  { %s37_s9 = sshll.u32 %s371_s8, 4  ;;  %s38_s9 = int_to_ptr.vmem [resolvable:$true] %s37_s9 }
  0x10   :  { %s330_s10 = scalar_lea.vmem %s38_s9, 256  ;;  %p335_p6 = scmp.lt.s32.totalorder %s38_s9, %s38_s9 }
  0x11   :  { %p331_p5 = scmp.ne.s32.totalorder %s38_s9, %s330_s10  ;;  %p336_p7 = scmp.lt.s32.totalorder %s330_s10, %s330_s10 }
  0x13   :  { %p337_p8 = por %p336_p7, %p335_p6 }
  0x15   :  { %p338_p9 = pnand %p337_p8, %p331_p5 }
  0x17   :  { %341 = shalt.err (!%p338_p9)
}
  0x18   :  { %43 = dma.hbm_to_vmem [thread:$0]  %s442_s3, 256, %s38_s9, [#allocation7], %s369_s27, %s369_s27, %s370_s28  }
  0x19   :  { %362 = dma.done.wait [#allocation4], 256  }
  0x1a   :  { %363 = vsyncadd [#allocation4], 4294967040 }
  0x1b   :  { %364 = dma.done.wait [#allocation7], 256  }
  0x1c   :  { %365 = vsyncadd [#allocation7], 4294967040  ;;  %v372_v0 = vmov 0.0   ;;  %vm373_vm0 = vmmov 0   ;;  %v298_v1 = vld [vmem:[#allocation3 + $0x8] sm:$0xff]   ;;  %v299_v2 = vld [vmem:[#allocation3] sm:$0xff]   ;;  %v208_v25 = vstv %s445_s6 }
  0x1d   :  { %275 = vmatprep.subr.bf16.mxu0 %v372_v0  ;;  %279 = vmatprep.mubr.msk.bf16.mxu0 %vm373_vm0, %v372_v0  ;;  %v57_v3 = vld [vmem:[%s439_s0] sm:$0x3]  ;;  %vm82_vm1 = vcmask 261120   ;;  %v300_v5 = vld [vmem:[#allocation6 + $0x8] sm:$0xff]   ;;  %v301_v6 = vld [vmem:[#allocation6] sm:$0xff]   ;;  %vm203_vm2 = vcmask 1041408  }
  0x1e   :  { %283 = vmatprep.subr.bf16.mxu1 %v372_v0  ;;  %287 = vmatprep.mubr.msk.bf16.mxu1 %vm373_vm0, %v372_v0  ;;  %v58_v4 = vpack.c.bf16 %v57_v3, %v57_v3  ;;  %v260_v7 = vld [vmem:[%s441_s2] ss:$0 sm:$0xff]  ;;  %vm242_vm3 = vcmask 8192  }
  0x1f   :  { %276 = vmatpush3.bf16.msra.mxu0 %v298_v1  ;;  %284 = vmatpush3.bf16.msra.mxu1 %v300_v5  ;;  %v264_v15 = vld [vmem:[%s443_s4] ss:$0 sm:$0xff]  ;;  %s374_s4 = smov [#allocation8]  }
  0x20   :  { %277 = vmatprep.subr.bf16.mxu0 %v372_v0  ;;  %285 = vmatprep.subr.bf16.mxu1 %v372_v0  ;;  %v268_v19 = vld [vmem:[%s444_s5] ss:$0 sm:$0xff]  ;;  %s250_s19 = sshll.u32 %s374_s4, 4  ;;  %s251_s19 = int_to_ptr.vmem [resolvable:$true] %s250_s19 }
  0x21   :  { %s342_s5 = scalar_lea.vmem %s251_s19, 16  ;;  %s346_s20 = scalar_lea.vmem %s251_s19, 32 }
  0x22   :  { %p343_p10 = scmp.ne.s32.totalorder %s251_s19, %s342_s5  ;;  %p347_p11 = scmp.lt.s32.totalorder %s251_s19, %s251_s19 }
  0x23   :  { %278 = vmatpush3.bf16.msra.mxu0 %v299_v2  ;;  %286 = vmatpush3.bf16.msra.mxu1 %v301_v6  ;;  %p348_p12 = scmp.lt.s32.totalorder %s346_s20, %s342_s5 }
  0x25   :  { %p349_p13 = por %p348_p12, %p347_p11 }
  0x26   :  { %280 = vmatmul.mubr.msk.bf16.vlgmr.msra.gmra.mxu0 %vm82_vm1, %v58_v4 }
  0x27   :  { %p350_p0 = pnand %p349_p13, %p343_p10 }
  0xe6   :  { %v120_v8 = vpop.f32.mrf.mxu0 }
  0xe7   :  { %v121_v9 = vadd.f32 %v260_v7, %v120_v8 }
  0xe8   :  { %v281_v10 = vpop.f32.mrf.mxu0 }
  0xe9   :  { %v126_v11 = vmax.f32 %v121_v9, 0.0 }
  0xea   :  { %v123_v12 = vpop.f32.mrf.mxu0 }
  0xeb   :  { %v127_v13 = vpack.c.bf16 %v126_v11, %v126_v11 }
  0xec   :  { %v282_v14 = vpop.f32.mrf.mxu0 }
  0xed   :  { %288 = vmatmul.mubr.msk.bf16.vlgmr.msra.gmra.mxu1 %vm82_vm1, %v127_v13 }
 0x1ad   :  { %v188_v16 = vpop.f32.mrf.mxu1 }
 0x1ae   :  { %v189_v17 = vadd.f32 %v264_v15, %v188_v16 }
 0x1af   :  { %v289_v18 = vpop.f32.mrf.mxu1 }
 0x1b0   :  { %v194_v20 = vmax.f32 %v189_v17, 0.0 }
 0x1b1   :  { %v191_v21 = vpop.f32.mrf.mxu1 }
 0x1b2   :  { %v202_v22 = vmul.f32 %v268_v19, %v194_v20 }
 0x1b3   :  { %v290_v23 = vpop.f32.mrf.mxu1 }
 0x1b4   :  { %v204_v24 = vsel %vm203_vm2, %v202_v22, 0.0 }
 0x1b5   :  { %205 = vadd.xlane.f32.xlu0 %v204_v24 }
 0x23e   :  { %v206_v26 = vpop.xlane.xlu0 %205 }
 0x23f   :  { %v209_v27 = vadd.f32 %v208_v25, %v206_v26 }
 0x241   :  { %210 = vxpose.xlu0.b32.start.end [1/1] (short) (narrow) %v209_v27, 8 }
 0x2bd   :  { %v226_v28 = vpop.trf.xlu0 }
 0x2be   :  { %243 = vst.msk [vmem:[#allocation8] sm:$0x1] %vm242_vm3, %v226_v28 }
 0x2bf   :  { %353 = shalt.err (!%p350_p0)
}
 0x2c0   :  { %253 = dma.vmem_to_hbm [thread:$0]  %s251_s19, 16, %s446_s7, [#allocation5]  }
 0x2c1   :  { %366 = dma.done.wait [#allocation5], 16  }
 0x2c2   :  { %367 = vsyncadd [#allocation5], 4294967280 }
 0x2c3   :  { %257 = vsyncpa [#allocation4], 1 }
 0x2c4   :  { %258 = vsyncpa [#allocation7], 1 }
 0x2c5   :  { %259 = vsyncpa [#allocation5], 1 }

</bundles_post_ra>
